<compile_context>
chip_gen: v6e
topology: v6e:2x2x1
jax: 0.10.0
libtpu: 0.0.40
codegen_flags: <defaults>
</compile_context>

<pallas_src>
import math

import jax
import jax.numpy as jnp
import numpy as np
from jax import lax
from jax.experimental import pallas as pl
from jax.experimental.pallas import tpu as pltpu


# ----------------------------------------------------------------------------
# Layout helpers
# ----------------------------------------------------------------------------
def _padded_channels(C, W):
    """Smallest Cp >= C such that W*Cp is a multiple of 128 (lane-dense vregs)."""
    step = 128 // math.gcd(W, 128)
    return max(C, ((C + step - 1) // step) * step)


def nchw_to_flat(x_nchw, Cp):
    """NCHW -> flat channel-minor (N, H, W*Cp) with zero channel padding.
    Do this ONCE at the model boundary (it is a full HBM pass)."""
    N, C, H, W = x_nchw.shape
    x = jnp.transpose(x_nchw, (0, 2, 3, 1))                   # NHWC
    if Cp > C:
        x = jnp.pad(x, ((0, 0), (0, 0), (0, 0), (0, Cp - C)))
    return x.reshape(N, H, W * Cp)


def flat_to_nchw(xflat, C, W):
    N, H, WC = xflat.shape
    Cp = WC // W
    x = xflat.reshape(N, H, W, Cp)[..., :C]
    return jnp.transpose(x, (0, 3, 1, 2))


# ----------------------------------------------------------------------------
# Fused Pallas kernel: (conv+bn+tanh) -> (conv+bn+residual+tanh)
# ----------------------------------------------------------------------------
def _make_fused_block_kernel(H, WC, bt, mm_dtype):
    def kernel(x_ref, w1_ref, s1_ref, b1_ref, w2_ref, s2_ref, b2_ref,
               out_ref, xpad_ref):
        # Zero ONLY the two vertical-padding rows; rows 1..H are always
        # overwritten below.  (No program_id==0 guard: "parallel" grid means
        # per-core scratch + unspecified iteration order.)
        zero_row = jnp.zeros((1, WC), jnp.float32)
        xpad_ref[pl.ds(0, 1), :] = zero_row
        xpad_ref[pl.ds(H + 1, 1), :] = zero_row

        # Resident per-channel BN scale / bias (f32, flat (1, W*Cp)).
        s1 = s1_ref[...]
        b1 = b1_ref[...]
        s2 = s2_ref[...]
        b2 = b2_ref[...]

        def conv3x3(w_ref):
            # 3x3 conv (stride=1, pad=1) = 3 MXU matmuls over vertically
            # shifted (H, W*Cp) windows of the padded slab; horizontal taps
            # AND horizontal zero padding live in the banded matrices
            # w_ref[kh].  Operands cast to mm_dtype (bf16 on v6e/v7x),
            # accumulation in f32.
            acc = jnp.dot(xpad_ref[pl.ds(0, H), :].astype(mm_dtype), w_ref[0],
                          preferred_element_type=jnp.float32)
            acc += jnp.dot(xpad_ref[pl.ds(1, H), :].astype(mm_dtype), w_ref[1],
                           preferred_element_type=jnp.float32)
            acc += jnp.dot(xpad_ref[pl.ds(2, H), :].astype(mm_dtype), w_ref[2],
                           preferred_element_type=jnp.float32)
            return acc                                            # (H, W*Cp) f32

        def body(b, carry):
            x = x_ref[b].astype(jnp.float32)                      # (H, W*Cp)
            # conv1 -> BN1 (separate f32 scale/bias) -> SelfTanh
            xpad_ref[pl.ds(1, H), :] = x
            y = jnp.tanh(conv3x3(w1_ref) * s1 + b1)
            # conv2 -> BN2 -> identity residual -> SelfTanh
            xpad_ref[pl.ds(1, H), :] = y
            z = conv3x3(w2_ref) * s2 + b2 + x
            out_ref[b] = jnp.tanh(z).astype(out_ref.dtype)
            return carry

        lax.fori_loop(0, bt, body, 0, unroll=True)

    return kernel


def basic_block_forward_flat(xflat, prep, *, images_per_step=None):
    """BasicBlock forward on the flat channel-minor layout (N, H, W*Cp).
    Chain this across consecutive blocks; convert NCHW<->flat only at the
    model boundary."""
    N, H, WC = xflat.shape
    assert WC == prep["w1"].shape[-1], "layout/params mismatch"
    if images_per_step is None:
        # Amortize the ~0.35us/step grid overhead, but keep >= 2 grid steps
        # so both TensorCores of a v7x megacore get work.
        images_per_step = max(1, N // 2)
    bt = math.gcd(int(images_per_step), N)            # must divide N
    mm_dtype = prep["w1"].dtype

    const3 = lambda n: (0, 0, 0)
    const2 = lambda n: (0, 0)
    return pl.pallas_call(
        _make_fused_block_kernel(H, WC, bt, mm_dtype),
        out_shape=jax.ShapeDtypeStruct((N, H, WC), xflat.dtype),
        grid=(N // bt,),
        in_specs=[
            pl.BlockSpec((bt, H, WC), lambda n: (n, 0, 0)),    # bt images / step
            pl.BlockSpec((3, WC, WC), const3),                 # banded w1 (resident)
            pl.BlockSpec((1, WC), const2),                     # bn1 scale (f32)
            pl.BlockSpec((1, WC), const2),                     # bn1 bias  (f32)
            pl.BlockSpec((3, WC, WC), const3),                 # banded w2 (resident)
            pl.BlockSpec((1, WC), const2),                     # bn2 scale (f32)
            pl.BlockSpec((1, WC), const2),                     # bn2 bias  (f32)
        ],
        out_specs=pl.BlockSpec((bt, H, WC), lambda n: (n, 0, 0)),  # lane-dense (128x)
        scratch_shapes=[pltpu.VMEM((H + 2, WC), jnp.float32)],     # vertical-pad slab
        compiler_params=pltpu.CompilerParams(dimension_semantics=("parallel",)),
    )(xflat, prep["w1"], prep["s1"], prep["b1"], prep["w2"], prep["s2"], prep["b2"])


def basic_block_forward(x_nchw, prep, *, images_per_step=None):
    """Drop-in NCHW wrapper (relayout happens here; for block stacks use the
    flat API so the relayout is paid only once at the model boundary)."""
    N, C, H, W = x_nchw.shape
    Cp = _padded_channels(C, W)
    xflat = nchw_to_flat(x_nchw, Cp)
    yflat = basic_block_forward_flat(xflat, prep, images_per_step=images_per_step)
    return flat_to_nchw(yflat, C, W)


# ----------------------------------------------------------------------------
# One-time inference-time parameter folding (sign, banding, BN fold)
# ----------------------------------------------------------------------------
def _fold_bn(gamma, beta, mean, var, eps=1e-5):
    scale = gamma / np.sqrt(var + eps)
    return scale, beta - mean * scale


def _banded_conv_weights(w_oihw, W, Cp, mm_dtype):
    """Binarize an OIHW 3x3 weight and build three banded (W*Cp, W*Cp)
    matrices (one per vertical tap kh) such that, on the flat (H, W*Cp)
    channel-minor layout with zero vertical padding,
        conv3x3(x)[h] = sum_kh xpad[h + kh] @ B[kh].
    The band encodes horizontal taps + horizontal padding; channel padding
    (C -> Cp) appears as zero rows/columns.  +/-1 and 0 are exact in bf16.

    NOTE: B is O((W*Cp)^2) per tap -- fine at CIFAR-ish widths, but for large
    W*C tile output columns with a band-aware index_map or use 9 per-tap
    (Cin, Cout) matmuls instead (v7x has only 64 MiB VMEM)."""
    Cout, Cin = w_oihw.shape[0], w_oihw.shape[1]
    wb = np.sign(w_oihw).astype(np.float32)                   # weight binarization
    wb = np.transpose(wb, (2, 3, 1, 0))                       # OIHW -> HWIO
    B = np.zeros((3, W * Cp, W * Cp), np.float32)
    for kh in range(3):
        for wo in range(W):                                   # output column
            for kw in range(3):
                wi = wo + kw - 1                              # input column
                if 0 <= wi < W:
                    B[kh, wi * Cp: wi * Cp + Cin,
                      wo * Cp: wo * Cp + Cout] = wb[kh, kw]
    return jnp.asarray(B, dtype=mm_dtype)


def _pad_tile_vec(v, Cp, W):
    out = np.zeros((Cp,), np.float32)
    out[: v.shape[0]] = v                                     # padded channels -> 0
    return jnp.asarray(np.tile(out, W).reshape(1, -1))


def prepare_block_params(params, W, mm_dtype=jnp.bfloat16):
    """Run ONCE at parameter-load time (never per forward call)."""
    p = {k: np.asarray(v) for k, v in params.items()}
    assert p["conv1_w"].shape[0] == p["conv1_w"].shape[1], \
        "identity residual requires inplanes == planes (stride=1, no downsample)"
    C = p["conv1_w"].shape[1]
    Cp = _padded_channels(C, W)
    s1, b1 = _fold_bn(p["bn1_gamma"], p["bn1_beta"], p["bn1_mean"], p["bn1_var"])
    s2, b2 = _fold_bn(p["bn2_gamma"], p["bn2_beta"], p["bn2_mean"], p["bn2_var"])
    return {
        "w1": _banded_conv_weights(p["conv1_w"], W, Cp, mm_dtype),
        "s1": _pad_tile_vec(s1, Cp, W),
        "b1": _pad_tile_vec(b1, Cp, W),
        "w2": _banded_conv_weights(p["conv2_w"], W, Cp, mm_dtype),
        "s2": _pad_tile_vec(s2, Cp, W),
        "b2": _pad_tile_vec(b2, Cp, W),
    }


def init_basic_block_params(key, inplanes, planes):
    ks = jax.random.split(key, 10)
    return {
        # PyTorch conv weight layout OIHW
        "conv1_w": jax.random.normal(ks[0], (planes, inplanes, 3, 3), jnp.float32) * 0.1,
        "conv2_w": jax.random.normal(ks[1], (planes, planes, 3, 3), jnp.float32) * 0.1,
        "bn1_gamma": jax.random.uniform(ks[2], (planes,), jnp.float32, 0.5, 1.5),
        "bn1_beta": jax.random.normal(ks[3], (planes,), jnp.float32) * 0.1,
        "bn1_mean": jax.random.normal(ks[4], (planes,), jnp.float32) * 0.5,
        # realistic running-var for a +/-1-weight 3x3 conv over `inplanes`
        # channels of ~unit-variance input (~9 * inplanes)
        "bn1_var": jax.random.uniform(ks[5], (planes,), jnp.float32, 0.5, 1.5) * (9.0 * inplanes),
        "bn2_gamma": jax.random.uniform(ks[6], (planes,), jnp.float32, 0.5, 1.5),
        "bn2_beta": jax.random.normal(ks[7], (planes,), jnp.float32) * 0.1,
        "bn2_mean": jax.random.normal(ks[8], (planes,), jnp.float32) * 0.5,
        "bn2_var": jax.random.uniform(ks[9], (planes,), jnp.float32, 0.5, 1.5) * (4.0 * planes),
    }


# ----------------------------------------------------------------------------
# Pure-JAX reference (for correctness check)
# ----------------------------------------------------------------------------
def _ref_forward(x_nchw, params):
    def conv(x, w):
        return lax.conv_general_dilated(
            x, w, window_strides=(1, 1), padding=((1, 1), (1, 1)),
            dimension_numbers=("NCHW", "OIHW", "NCHW"))

    def bn(x, g, b, m, v, eps=1e-5):
        g, b, m, v = (t.reshape(1, -1, 1, 1) for t in (g, b, m, v))
        return (x - m) / jnp.sqrt(v + eps) * g + b

    residual = x_nchw
    out = conv(x_nchw, jnp.sign(params["conv1_w"]))
    out = jnp.tanh(bn(out, params["bn1_gamma"], params["bn1_beta"],
                      params["bn1_mean"], params["bn1_var"]))
    out = conv(out, jnp.sign(params["conv2_w"]))
    out = bn(out, params["bn2_gamma"], params["bn2_beta"],
             params["bn2_mean"], params["bn2_var"])
    return jnp.tanh(out + residual)


if __name__ == "__main__":
    key = jax.random.PRNGKey(0)
    kx, kp = jax.random.split(key)

    N, C, H, W = 2, 4, 16, 16          # inplanes = planes = 4, stride = 1
    x = jax.random.normal(kx, (N, C, H, W), jnp.float32)
    params = init_basic_block_params(kp, inplanes=C, planes=C)
    ref = jax.block_until_ready(_ref_forward(x, params))

    fwd = jax.jit(basic_block_forward)

    # (1) f32 MXU operands: tight check of the fused banded-conv math.
    prep32 = prepare_block_params(params, W, mm_dtype=jnp.float32)
    out32 = jax.block_until_ready(fwd(x, prep32))
    assert out32.shape == (N, C, H, W)
    np.testing.assert_allclose(np.asarray(out32), np.asarray(ref),
                               rtol=1e-4, atol=1e-4)

    # (2) bf16 MXU operands (recommended on v6e/v7x): weights are exact +/-1
    #     in bf16 and BN scale/bias stay f32, so the only difference is
    #     activation rounding -> looser tolerance.
    prep16 = prepare_block_params(params, W, mm_dtype=jnp.bfloat16)
    out16 = jax.block_until_ready(fwd(x, prep16))
    np.testing.assert_allclose(np.asarray(out16), np.asarray(ref),
                               rtol=5e-2, atol=5e-2)

    print("KERNEL_OK")
</pallas_src>

<mosaic_0001>
module attributes {stable_mosaic.version = 11 : i64} {
  func.func @kernel(%arg0: i32, %arg1: memref<1x16x128xf32, #tpu.memory_space<vmem>>, %arg2: memref<3x128x128xf32, #tpu.memory_space<vmem>>, %arg3: memref<1x128xf32, #tpu.memory_space<vmem>>, %arg4: memref<1x128xf32, #tpu.memory_space<vmem>>, %arg5: memref<3x128x128xf32, #tpu.memory_space<vmem>>, %arg6: memref<1x128xf32, #tpu.memory_space<vmem>>, %arg7: memref<1x128xf32, #tpu.memory_space<vmem>>, %arg8: memref<1x16x128xf32, #tpu.memory_space<vmem>>, %arg9: memref<18x128xf32, #tpu.memory_space<vmem>>) attributes {dimension_semantics = [#tpu.dimension_semantics<parallel>], iteration_bounds = array<i64: 2>, scalar_prefetch = 0 : i64, scratch_operands = 1 : i64, tpu.core_type = #tpu.core_type<tc>, window_params = [{transform_indices = @transform_0, window_bounds = array<i64: 1, 16, 128>}, {pipeline_mode = #tpu.pipeline_mode<synchronous>, transform_indices = @transform_1, window_bounds = array<i64: 3, 128, 128>}, {pipeline_mode = #tpu.pipeline_mode<synchronous>, transform_indices = @transform_2, window_bounds = array<i64: 1, 128>}, {pipeline_mode = #tpu.pipeline_mode<synchronous>, transform_indices = @transform_3, window_bounds = array<i64: 1, 128>}, {pipeline_mode = #tpu.pipeline_mode<synchronous>, transform_indices = @transform_4, window_bounds = array<i64: 3, 128, 128>}, {pipeline_mode = #tpu.pipeline_mode<synchronous>, transform_indices = @transform_5, window_bounds = array<i64: 1, 128>}, {pipeline_mode = #tpu.pipeline_mode<synchronous>, transform_indices = @transform_6, window_bounds = array<i64: 1, 128>}, {transform_indices = @transform_7, window_bounds = array<i64: 1, 16, 128>}]} {
    %cst = arith.constant 0.000000e+00 : f32
    %0 = vector.broadcast %cst : f32 to vector<1x128xf32>
    %c0 = arith.constant 0 : index
    %c0_0 = arith.constant 0 : index
    %1 = vector.load %arg9[%c0, %c0_0] : memref<18x128xf32, #tpu.memory_space<vmem>>, vector<1x128xf32>
    tpu.vector_store %arg9[%c0, %c0_0], %0 {strides = array<i32>} : memref<18x128xf32, #tpu.memory_space<vmem>>, vector<1x128xf32>,
    %c17 = arith.constant 17 : index
    %c0_1 = arith.constant 0 : index
    %2 = vector.load %arg9[%c17, %c0_1] : memref<18x128xf32, #tpu.memory_space<vmem>>, vector<1x128xf32>
    tpu.vector_store %arg9[%c17, %c0_1], %0 {strides = array<i32>} : memref<18x128xf32, #tpu.memory_space<vmem>>, vector<1x128xf32>,
    %c0_2 = arith.constant 0 : index
    %c0_3 = arith.constant 0 : index
    %3 = vector.load %arg3[%c0_2, %c0_3] : memref<1x128xf32, #tpu.memory_space<vmem>>, vector<1x128xf32>
    %c0_4 = arith.constant 0 : index
    %c0_5 = arith.constant 0 : index
    %4 = vector.load %arg4[%c0_4, %c0_5] : memref<1x128xf32, #tpu.memory_space<vmem>>, vector<1x128xf32>
    %c0_6 = arith.constant 0 : index
    %c0_7 = arith.constant 0 : index
    %5 = vector.load %arg6[%c0_6, %c0_7] : memref<1x128xf32, #tpu.memory_space<vmem>>, vector<1x128xf32>
    %c0_8 = arith.constant 0 : index
    %c0_9 = arith.constant 0 : index
    %6 = vector.load %arg7[%c0_8, %c0_9] : memref<1x128xf32, #tpu.memory_space<vmem>>, vector<1x128xf32>
    %c0_i32 = arith.constant 0 : i32
    %7 = arith.index_cast %c0_i32 : i32 to index
    %c0_10 = arith.constant 0 : index
    %c0_11 = arith.constant 0 : index
    %8 = vector.load %arg1[%7, %c0_10, %c0_11] : memref<1x16x128xf32, #tpu.memory_space<vmem>>, vector<1x16x128xf32>
    %9 = vector.shape_cast %8 : vector<1x16x128xf32> to vector<16x128xf32>
    %c1 = arith.constant 1 : index
    %c0_12 = arith.constant 0 : index
    %10 = vector.load %arg9[%c1, %c0_12] : memref<18x128xf32, #tpu.memory_space<vmem>>, vector<16x128xf32>
    tpu.vector_store %arg9[%c1, %c0_12], %9 {strides = array<i32>} : memref<18x128xf32, #tpu.memory_space<vmem>>, vector<16x128xf32>,
    %c0_13 = arith.constant 0 : index
    %c0_14 = arith.constant 0 : index
    %11 = vector.load %arg9[%c0_13, %c0_14] : memref<18x128xf32, #tpu.memory_space<vmem>>, vector<16x128xf32>
    %c0_15 = arith.constant 0 : index
    %c0_16 = arith.constant 0 : index
    %c0_17 = arith.constant 0 : index
    %12 = vector.load %arg2[%c0_15, %c0_16, %c0_17] : memref<3x128x128xf32, #tpu.memory_space<vmem>>, vector<1x128x128xf32>
    %13 = vector.shape_cast %12 : vector<1x128x128xf32> to vector<128x128xf32>
    %cst_18 = arith.constant dense<0.000000e+00> : vector<16x128xf32>
    %14 = tpu.matmul %11, %13, %cst_18 {dimension_numbers = #tpu.dot_dimension_numbers<[1], [0], [0], [1], [0, 0, 1, 1], [], []>} : vector<16x128xf32>, vector<128x128xf32>, vector<16x128xf32> -> vector<16x128xf32>
    %c1_19 = arith.constant 1 : index
    %c0_20 = arith.constant 0 : index
    %15 = vector.load %arg9[%c1_19, %c0_20] : memref<18x128xf32, #tpu.memory_space<vmem>>, vector<16x128xf32>
    %c1_21 = arith.constant 1 : index
    %c0_22 = arith.constant 0 : index
    %c0_23 = arith.constant 0 : index
    %16 = vector.load %arg2[%c1_21, %c0_22, %c0_23] : memref<3x128x128xf32, #tpu.memory_space<vmem>>, vector<1x128x128xf32>
    %17 = vector.shape_cast %16 : vector<1x128x128xf32> to vector<128x128xf32>
    %cst_24 = arith.constant dense<0.000000e+00> : vector<16x128xf32>
    %18 = tpu.matmul %15, %17, %cst_24 {dimension_numbers = #tpu.dot_dimension_numbers<[1], [0], [0], [1], [0, 0, 1, 1], [], []>} : vector<16x128xf32>, vector<128x128xf32>, vector<16x128xf32> -> vector<16x128xf32>
    %19 = arith.addf %14, %18 : vector<16x128xf32>
    %c2 = arith.constant 2 : index
    %c0_25 = arith.constant 0 : index
    %20 = vector.load %arg9[%c2, %c0_25] : memref<18x128xf32, #tpu.memory_space<vmem>>, vector<16x128xf32>
    %c2_26 = arith.constant 2 : index
    %c0_27 = arith.constant 0 : index
    %c0_28 = arith.constant 0 : index
    %21 = vector.load %arg2[%c2_26, %c0_27, %c0_28] : memref<3x128x128xf32, #tpu.memory_space<vmem>>, vector<1x128x128xf32>
    %22 = vector.shape_cast %21 : vector<1x128x128xf32> to vector<128x128xf32>
    %cst_29 = arith.constant dense<0.000000e+00> : vector<16x128xf32>
    %23 = tpu.matmul %20, %22, %cst_29 {dimension_numbers = #tpu.dot_dimension_numbers<[1], [0], [0], [1], [0, 0, 1, 1], [], []>} : vector<16x128xf32>, vector<128x128xf32>, vector<16x128xf32> -> vector<16x128xf32>
    %24 = arith.addf %19, %23 : vector<16x128xf32>
    %25 = vector.broadcast %3 : vector<1x128xf32> to vector<16x128xf32>
    %26 = arith.mulf %24, %25 : vector<16x128xf32>
    %27 = vector.broadcast %4 : vector<1x128xf32> to vector<16x128xf32>
    %28 = arith.addf %26, %27 : vector<16x128xf32>
    %29 = math.tanh %28 : vector<16x128xf32>
    %c1_30 = arith.constant 1 : index
    %c0_31 = arith.constant 0 : index
    %30 = vector.load %arg9[%c1_30, %c0_31] : memref<18x128xf32, #tpu.memory_space<vmem>>, vector<16x128xf32>
    tpu.vector_store %arg9[%c1_30, %c0_31], %29 {strides = array<i32>} : memref<18x128xf32, #tpu.memory_space<vmem>>, vector<16x128xf32>,
    %c0_32 = arith.constant 0 : index
    %c0_33 = arith.constant 0 : index
    %31 = vector.load %arg9[%c0_32, %c0_33] : memref<18x128xf32, #tpu.memory_space<vmem>>, vector<16x128xf32>
    %c0_34 = arith.constant 0 : index
    %c0_35 = arith.constant 0 : index
    %c0_36 = arith.constant 0 : index
    %32 = vector.load %arg5[%c0_34, %c0_35, %c0_36] : memref<3x128x128xf32, #tpu.memory_space<vmem>>, vector<1x128x128xf32>
    %33 = vector.shape_cast %32 : vector<1x128x128xf32> to vector<128x128xf32>
    %cst_37 = arith.constant dense<0.000000e+00> : vector<16x128xf32>
    %34 = tpu.matmul %31, %33, %cst_37 {dimension_numbers = #tpu.dot_dimension_numbers<[1], [0], [0], [1], [0, 0, 1, 1], [], []>} : vector<16x128xf32>, vector<128x128xf32>, vector<16x128xf32> -> vector<16x128xf32>
    %c1_38 = arith.constant 1 : index
    %c0_39 = arith.constant 0 : index
    %35 = vector.load %arg9[%c1_38, %c0_39] : memref<18x128xf32, #tpu.memory_space<vmem>>, vector<16x128xf32>
    %c1_40 = arith.constant 1 : index
    %c0_41 = arith.constant 0 : index
    %c0_42 = arith.constant 0 : index
    %36 = vector.load %arg5[%c1_40, %c0_41, %c0_42] : memref<3x128x128xf32, #tpu.memory_space<vmem>>, vector<1x128x128xf32>
    %37 = vector.shape_cast %36 : vector<1x128x128xf32> to vector<128x128xf32>
    %cst_43 = arith.constant dense<0.000000e+00> : vector<16x128xf32>
    %38 = tpu.matmul %35, %37, %cst_43 {dimension_numbers = #tpu.dot_dimension_numbers<[1], [0], [0], [1], [0, 0, 1, 1], [], []>} : vector<16x128xf32>, vector<128x128xf32>, vector<16x128xf32> -> vector<16x128xf32>
    %39 = arith.addf %34, %38 : vector<16x128xf32>
    %c2_44 = arith.constant 2 : index
    %c0_45 = arith.constant 0 : index
    %40 = vector.load %arg9[%c2_44, %c0_45] : memref<18x128xf32, #tpu.memory_space<vmem>>, vector<16x128xf32>
    %c2_46 = arith.constant 2 : index
    %c0_47 = arith.constant 0 : index
    %c0_48 = arith.constant 0 : index
    %41 = vector.load %arg5[%c2_46, %c0_47, %c0_48] : memref<3x128x128xf32, #tpu.memory_space<vmem>>, vector<1x128x128xf32>
    %42 = vector.shape_cast %41 : vector<1x128x128xf32> to vector<128x128xf32>
    %cst_49 = arith.constant dense<0.000000e+00> : vector<16x128xf32>
    %43 = tpu.matmul %40, %42, %cst_49 {dimension_numbers = #tpu.dot_dimension_numbers<[1], [0], [0], [1], [0, 0, 1, 1], [], []>} : vector<16x128xf32>, vector<128x128xf32>, vector<16x128xf32> -> vector<16x128xf32>
    %44 = arith.addf %39, %43 : vector<16x128xf32>
    %45 = vector.broadcast %5 : vector<1x128xf32> to vector<16x128xf32>
    %46 = arith.mulf %44, %45 : vector<16x128xf32>
    %47 = vector.broadcast %6 : vector<1x128xf32> to vector<16x128xf32>
    %48 = arith.addf %46, %47 : vector<16x128xf32>
    %49 = arith.addf %48, %9 : vector<16x128xf32>
    %50 = math.tanh %49 : vector<16x128xf32>
    %51 = arith.index_cast %c0_i32 : i32 to index
    %c0_50 = arith.constant 0 : index
    %c0_51 = arith.constant 0 : index
    %52 = vector.load %arg8[%51, %c0_50, %c0_51] : memref<1x16x128xf32, #tpu.memory_space<vmem>>, vector<1x16x128xf32>
    %53 = vector.shape_cast %52 : vector<1x16x128xf32> to vector<16x128xf32>
    %54 = vector.shape_cast %50 : vector<16x128xf32> to vector<1x16x128xf32>
    tpu.vector_store %arg8[%51, %c0_50, %c0_51], %54 {strides = array<i32>} : memref<1x16x128xf32, #tpu.memory_space<vmem>>, vector<1x16x128xf32>,
    %c1_i32 = arith.constant 1 : i32
    return
  }
  func.func @transform_0(%arg0: i32) -> (i32, i32, i32) {
    %c0_i32 = arith.constant 0 : i32
    %c0_i32_0 = arith.constant 0 : i32
    %c0_i32_1 = arith.constant 0 : i32
    return %arg0, %c0_i32, %c0_i32_0 : i32, i32, i32
  }
  func.func @transform_1(%arg0: i32) -> (i32, i32, i32) {
    %c0_i32 = arith.constant 0 : i32
    %c0_i32_0 = arith.constant 0 : i32
    %c0_i32_1 = arith.constant 0 : i32
    %c0_i32_2 = arith.constant 0 : i32
    return %c0_i32, %c0_i32_0, %c0_i32_1 : i32, i32, i32
  }
  func.func @transform_2(%arg0: i32) -> (i32, i32) {
    %c0_i32 = arith.constant 0 : i32
    %c0_i32_0 = arith.constant 0 : i32
    %c0_i32_1 = arith.constant 0 : i32
    return %c0_i32, %c0_i32_0 : i32, i32
  }
  func.func @transform_3(%arg0: i32) -> (i32, i32) {
    %c0_i32 = arith.constant 0 : i32
    %c0_i32_0 = arith.constant 0 : i32
    %c0_i32_1 = arith.constant 0 : i32
    return %c0_i32, %c0_i32_0 : i32, i32
  }
  func.func @transform_4(%arg0: i32) -> (i32, i32, i32) {
    %c0_i32 = arith.constant 0 : i32
    %c0_i32_0 = arith.constant 0 : i32
    %c0_i32_1 = arith.constant 0 : i32
    %c0_i32_2 = arith.constant 0 : i32
    return %c0_i32, %c0_i32_0, %c0_i32_1 : i32, i32, i32
  }
  func.func @transform_5(%arg0: i32) -> (i32, i32) {
    %c0_i32 = arith.constant 0 : i32
    %c0_i32_0 = arith.constant 0 : i32
    %c0_i32_1 = arith.constant 0 : i32
    return %c0_i32, %c0_i32_0 : i32, i32
  }
  func.func @transform_6(%arg0: i32) -> (i32, i32) {
    %c0_i32 = arith.constant 0 : i32
    %c0_i32_0 = arith.constant 0 : i32
    %c0_i32_1 = arith.constant 0 : i32
    return %c0_i32, %c0_i32_0 : i32, i32
  }
  func.func @transform_7(%arg0: i32) -> (i32, i32, i32) {
    %c0_i32 = arith.constant 0 : i32
    %c0_i32_0 = arith.constant 0 : i32
    %c0_i32_1 = arith.constant 0 : i32
    return %arg0, %c0_i32, %c0_i32_0 : i32, i32, i32
  }
}

</mosaic_0001>

<bundles_post_ra>
// kernel: basic_block_forward.1
= control target key start
LH: loop header
LB: loop body
LE: loop exit
PB: predicated region body
PF: predicated region fallthrough
CT: control target
= control target key end

     0   :  { %s1417_s24 = smov 0   ;;  %s1751_s0 = inlined_call_operand.vmem [shape: f32[2,16,128], index: 0, kind: input, shape index: {}]   ;;  %s1752_s1 = inlined_call_operand.vmem [shape: f32[3,128,128], index: 1, kind: input, shape index: {}]   ;;  %s1753_s2 = inlined_call_operand.vmem [shape: f32[1,128], index: 2, kind: input, shape index: {}]   ;;  %s1754_s3 = inlined_call_operand.vmem [shape: f32[1,128], index: 3, kind: input, shape index: {}]   ;;  %s1755_s4 = inlined_call_operand.vmem [shape: f32[3,128,128], index: 4, kind: input, shape index: {}]   ;;  %s1756_s5 = inlined_call_operand.vmem [shape: f32[1,128], index: 5, kind: input, shape index: {}]   ;;  %s1757_s6 = inlined_call_operand.vmem [shape: f32[1,128], index: 6, kind: input, shape index: {}]   ;;  %s1758_s7 = inlined_call_operand.vmem [shape: f32[2,16,128], index: 7, kind: output, shape index: {}]  }
   0x1 LB: > { %s952_s25 = sadd.s32 4294967295, %s1374_s24   ;;  %p956_p0 = scmp.ge.s32.totalorder %s1374_s24, 1  ;;  %s1374_s24 = sphi %s1417_s24, %s17_s24  }
   0x2   : > { %p237_p1 = scmp.lt.s32.totalorder %s1374_s24, 3 }
   0x4   : > { %p238_p2 = pnand %p956_p0, %p237_p1 }
   0x5   : > { %p269_p3 = scmp.lt.s32.totalorder (!%p238_p2), %s952_s25, 1 }
   0x6   : > { %241 = sbr.rel (%p238_p2) target bundleno = 545 (0x221), region = 48 }
   0xb   : > { %v976_v0 = vld [vmem:[%s1752_s1 + $0xf8] sm:$0xff]  ;;  %v975_v2 = vld [vmem:[%s1752_s1 + $0xf0] sm:$0xff]  ;;  %v1376_v4 = vmov 0.0   ;;  %v974_v5 = vld [vmem:[%s1752_s1 + $0xe8] sm:$0xff]  ;;  %s1760_s25 = smov (!%p269_p3, %s952_s25), 1 }
   0xc   : > { %v306_v1 = vld [vmem:[%s1752_s1 + $0x78] sm:$0xff]  ;;  %1141 = vmatprep.subr.mxu0 %v976_v0  ;;  %v305_v3 = vld [vmem:[%s1752_s1 + $0x70] sm:$0xff]  ;;  %279 = vst [vmem:[#allocation2] sm:$0x1] %v1376_v4  ;;  %280 = vst [vmem:[#allocation2 + $0x11] sm:$0x1] %v1376_v4 }
   0xd   : > { %1176 = vmatprep.subr.mxu1 %v306_v1  ;;  %1142 = vmatpush3.msra.mxu0 %v976_v0  ;;  %v304_v6 = vld [vmem:[%s1752_s1 + $0x68] sm:$0xff]  ;;  %v973_v7 = vld [vmem:[%s1752_s1 + $0xe0] sm:$0xff]  ;;  %s1031_s19 = sshll.u32 %s1760_s25, 4  ;;  %v972_v9 = vld [vmem:[%s1752_s1 + $0xd8] sm:$0xff] }
   0xe   : > { %1177 = vmatpush3.msra.mxu1 %v306_v1  ;;  %1143 = vmatprep.subr.mxu0 %v975_v2  ;;  %v303_v8 = vld [vmem:[%s1752_s1 + $0x60] sm:$0xff]  ;;  %v302_v10 = vld [vmem:[%s1752_s1 + $0x58] sm:$0xff]  ;;  %s273_s28 = scalar_lea.vmem %s1751_s0, %s1031_s19  ;;  %v971_v11 = vld [vmem:[%s1752_s1 + $0xd0] sm:$0xff]  ;;  %s278_s8 = scalar_lea.vmem %s1758_s7, %s1031_s19 }
   0xf   : > { %1178 = vmatprep.subr.mxu1 %v305_v3  ;;  %1144 = vmatpush3.msra.mxu0 %v975_v2  ;;  %v301_v12 = vld [vmem:[%s1752_s1 + $0x50] sm:$0xff]  ;;  %v970_v13 = vld [vmem:[%s1752_s1 + $0xc8] sm:$0xff]  ;;  %v1475_v15 = vld [vmem:[%s273_s28] sm:$0xff] }
  0x10   : > { %1179 = vmatpush3.msra.mxu1 %v305_v3  ;;  %1145 = vmatprep.subr.mxu0 %v974_v5  ;;  %v300_v14 = vld [vmem:[%s1752_s1 + $0x48] sm:$0xff]  ;;  %287 = vst [vmem:[#allocation2 + $0x1] sm:$0xff] %v1475_v15  ;;  %v969_v17 = vld [vmem:[%s1752_s1 + $0xc0] sm:$0xff]  ;;  %v968_v19 = vld [vmem:[%s1752_s1 + $0xb8] sm:$0xff] }
  0x11   : > { %1180 = vmatprep.subr.mxu1 %v304_v6  ;;  %1146 = vmatpush3.msra.mxu0 %v974_v5  ;;  %v1478_v16 = vld [vmem:[%s273_s28 + $0x8] sm:$0xff]  ;;  %v299_v18 = vld [vmem:[%s1752_s1 + $0x40] sm:$0xff]  ;;  %v298_v20 = vld [vmem:[%s1752_s1 + $0x38] sm:$0xff] }
  0x12   : > { %1181 = vmatpush3.msra.mxu1 %v304_v6  ;;  %1147 = vmatprep.subr.mxu0 %v973_v7  ;;  %288 = vst [vmem:[#allocation2 + $0x9] sm:$0xff] %v1478_v16  ;;  %v967_v21 = vld [vmem:[%s1752_s1 + $0xb0] sm:$0xff]  ;;  %v966_v23 = vld [vmem:[%s1752_s1 + $0xa8] sm:$0xff]  ;;  %v965_v25 = vld [vmem:[%s1752_s1 + $0xa0] sm:$0xff] }
  0x13   : > { %1182 = vmatprep.subr.mxu1 %v303_v8  ;;  %1148 = vmatpush3.msra.mxu0 %v973_v7  ;;  %v297_v22 = vld [vmem:[%s1752_s1 + $0x30] sm:$0xff]  ;;  %v296_v24 = vld [vmem:[%s1752_s1 + $0x28] sm:$0xff]  ;;  %v295_v26 = vld [vmem:[%s1752_s1 + $0x20] sm:$0xff] }
  0x14   : > { %1183 = vmatpush3.msra.mxu1 %v303_v8  ;;  %1149 = vmatprep.subr.mxu0 %v972_v9  ;;  %v964_v27 = vld [vmem:[%s1752_s1 + $0x98] sm:$0xff]  ;;  %v963_v29 = vld [vmem:[%s1752_s1 + $0x90] sm:$0xff]  ;;  %v962_v31 = vld [vmem:[%s1752_s1 + $0x88] sm:$0xff] }
  0x15   : > { %1184 = vmatprep.subr.mxu1 %v302_v10  ;;  %1150 = vmatpush3.msra.mxu0 %v972_v9  ;;  %v294_v28 = vld [vmem:[%s1752_s1 + $0x18] sm:$0xff]  ;;  %v293_v30 = vld [vmem:[%s1752_s1 + $0x10] sm:$0xff]  ;;  %v292_v32 = vld [vmem:[%s1752_s1 + $0x8] sm:$0xff] }
  0x16   : > { %1185 = vmatpush3.msra.mxu1 %v302_v10  ;;  %1151 = vmatprep.subr.mxu0 %v971_v11  ;;  %v961_v33 = vld [vmem:[%s1752_s1 + $0x80] sm:$0xff]  ;;  %v992_v37 = vld [vmem:[%s1752_s1 + $0x178] sm:$0xff]  ;;  %v991_v39 = vld [vmem:[%s1752_s1 + $0x170] sm:$0xff] }
  0x17   : > { %1186 = vmatprep.subr.mxu1 %v301_v12  ;;  %1152 = vmatpush3.msra.mxu0 %v971_v11  ;;  %v291_v34 = vld [vmem:[%s1752_s1] sm:$0xff]  ;;  %v990_v40 = vld [vmem:[%s1752_s1 + $0x168] sm:$0xff]  ;;  %v988_v42 = vld [vmem:[%s1752_s1 + $0x158] sm:$0xff] }
  0x18   : > { %1187 = vmatpush3.msra.mxu1 %v301_v12  ;;  %1153 = vmatprep.subr.mxu0 %v970_v13  ;;  %v289_v35 = vld [vmem:[#allocation2] sm:$0xff]  ;;  %v987_v43 = vld [vmem:[%s1752_s1 + $0x150] sm:$0xff]  ;;  %v986_v44 = vld [vmem:[%s1752_s1 + $0x148] sm:$0xff] }
  0x19   : > { %1188 = vmatprep.subr.mxu1 %v300_v14  ;;  %1154 = vmatpush3.msra.mxu0 %v970_v13  ;;  %v290_v36 = vld [vmem:[#allocation2 + $0x8] sm:$0xff]  ;;  %v989_v41 = vld [vmem:[%s1752_s1 + $0x160] sm:$0xff]  ;;  %v984_v46 = vld [vmem:[%s1752_s1 + $0x138] sm:$0xff] }
  0x1a   : > { %1189 = vmatpush3.msra.mxu1 %v300_v14  ;;  %1155 = vmatprep.subr.mxu0 %v969_v17  ;;  %v476_v38 = vld [vmem:[#allocation2 + $0x2] sm:$0xff]  ;;  %v983_v47 = vld [vmem:[%s1752_s1 + $0x130] sm:$0xff]  ;;  %v980_v50 = vld [vmem:[%s1752_s1 + $0x118] sm:$0xff] }
  0x1b   : > { %1190 = vmatprep.subr.mxu1 %v299_v18  ;;  %1156 = vmatpush3.msra.mxu0 %v969_v17  ;;  %v985_v45 = vld [vmem:[%s1752_s1 + $0x140] sm:$0xff]  ;;  %v982_v48 = vld [vmem:[%s1752_s1 + $0x128] sm:$0xff]  ;;  %v979_v51 = vld [vmem:[%s1752_s1 + $0x110] sm:$0xff] }
  0x1c   : > { %1191 = vmatpush3.msra.mxu1 %v299_v18  ;;  %1157 = vmatprep.subr.mxu0 %v968_v19  ;;  %v981_v49 = vld [vmem:[%s1752_s1 + $0x120] sm:$0xff]  ;;  %v978_v52 = vld [vmem:[%s1752_s1 + $0x108] sm:$0xff]  ;;  %v1010_v55 = vld [vmem:[%s1755_s4 + $0xf8] sm:$0xff] }
  0x1d   : > { %1192 = vmatprep.subr.mxu1 %v298_v20  ;;  %1158 = vmatpush3.msra.mxu0 %v968_v19  ;;  %v977_v53 = vld [vmem:[%s1752_s1 + $0x100] sm:$0xff]  ;;  %v477_v54 = vld [vmem:[#allocation2 + $0xa] sm:$0xff]  ;;  %v1006_v59 = vld [vmem:[%s1755_s4 + $0xd8] sm:$0xff] }
  0x1e   : > { %1193 = vmatpush3.msra.mxu1 %v298_v20  ;;  %1159 = vmatprep.subr.mxu0 %v967_v21  ;;  %v1009_v56 = vld [vmem:[%s1755_s4 + $0xf0] sm:$0xff]  ;;  %v1008_v57 = vld [vmem:[%s1755_s4 + $0xe8] sm:$0xff]  ;;  %v1007_v58 = vld [vmem:[%s1755_s4 + $0xe0] sm:$0xff] }
  0x1f   : > { %1194 = vmatprep.subr.mxu1 %v297_v22  ;;  %1160 = vmatpush3.msra.mxu0 %v967_v21  ;;  %v609_v60 = vld [vmem:[%s1755_s4 + $0x78] sm:$0xff]  ;;  %v1005_v61 = vld [vmem:[%s1755_s4 + $0xd0] sm:$0xff]  ;;  %v1004_v63 = vld [vmem:[%s1755_s4 + $0xc8] sm:$0xff] }
  0x20   : > { %1195 = vmatpush3.msra.mxu1 %v297_v22  ;;  %1161 = vmatprep.subr.mxu0 %v966_v23  ;;  %v608_v62 = vld [vmem:[%s1755_s4 + $0x70] sm:$0xff]  ;;  %v607_v0 = vld [vmem:[%s1755_s4 + $0x68] sm:$0xff]  ;;  %v1003_v1 = vld [vmem:[%s1755_s4 + $0xc0] sm:$0xff] }
  0x21   : > { %1196 = vmatprep.subr.mxu1 %v296_v24  ;;  %1162 = vmatpush3.msra.mxu0 %v966_v23  ;;  %v606_v2 = vld [vmem:[%s1755_s4 + $0x60] sm:$0xff]  ;;  %v1002_v3 = vld [vmem:[%s1755_s4 + $0xb8] sm:$0xff]  ;;  %v1001_v5 = vld [vmem:[%s1755_s4 + $0xb0] sm:$0xff] }
  0x22   : > { %1197 = vmatpush3.msra.mxu1 %v296_v24  ;;  %1163 = vmatprep.subr.mxu0 %v965_v25  ;;  %v605_v4 = vld [vmem:[%s1755_s4 + $0x58] sm:$0xff]  ;;  %v604_v6 = vld [vmem:[%s1755_s4 + $0x50] sm:$0xff]  ;;  %v1000_v7 = vld [vmem:[%s1755_s4 + $0xa8] sm:$0xff] }
  0x23   : > { %1198 = vmatprep.subr.mxu1 %v295_v26  ;;  %1164 = vmatpush3.msra.mxu0 %v965_v25  ;;  %v603_v8 = vld [vmem:[%s1755_s4 + $0x48] sm:$0xff]  ;;  %v999_v9 = vld [vmem:[%s1755_s4 + $0xa0] sm:$0xff]  ;;  %v998_v11 = vld [vmem:[%s1755_s4 + $0x98] sm:$0xff] }
  0x24   : > { %1199 = vmatpush3.msra.mxu1 %v295_v26  ;;  %1165 = vmatprep.subr.mxu0 %v964_v27  ;;  %v602_v10 = vld [vmem:[%s1755_s4 + $0x40] sm:$0xff]  ;;  %v601_v12 = vld [vmem:[%s1755_s4 + $0x38] sm:$0xff]  ;;  %v997_v13 = vld [vmem:[%s1755_s4 + $0x90] sm:$0xff] }
  0x25   : > { %1200 = vmatprep.subr.mxu1 %v294_v28  ;;  %1166 = vmatpush3.msra.mxu0 %v964_v27  ;;  %v600_v14 = vld [vmem:[%s1755_s4 + $0x30] sm:$0xff]  ;;  %v996_v17 = vld [vmem:[%s1755_s4 + $0x88] sm:$0xff]  ;;  %v995_v19 = vld [vmem:[%s1755_s4 + $0x80] sm:$0xff] }
  0x26   : > { %1201 = vmatpush3.msra.mxu1 %v294_v28  ;;  %1167 = vmatprep.subr.mxu0 %v963_v29  ;;  %v599_v18 = vld [vmem:[%s1755_s4 + $0x28] sm:$0xff]  ;;  %v598_v20 = vld [vmem:[%s1755_s4 + $0x20] sm:$0xff]  ;;  %v1026_v21 = vld [vmem:[%s1755_s4 + $0x178] sm:$0xff] }
  0x27   : > { %1202 = vmatprep.subr.mxu1 %v293_v30  ;;  %1168 = vmatpush3.msra.mxu0 %v963_v29  ;;  %v597_v22 = vld [vmem:[%s1755_s4 + $0x18] sm:$0xff]  ;;  %v596_v23 = vld [vmem:[%s1755_s4 + $0x10] sm:$0xff]  ;;  %v595_v24 = vld [vmem:[%s1755_s4 + $0x8] sm:$0xff] }
  0x28   : > { %1203 = vmatpush3.msra.mxu1 %v293_v30  ;;  %1169 = vmatprep.subr.mxu0 %v962_v31  ;;  %v594_v25 = vld [vmem:[%s1755_s4] sm:$0xff] }
  0x29   : > { %1204 = vmatprep.subr.mxu1 %v292_v32  ;;  %1170 = vmatpush3.msra.mxu0 %v962_v31  ;;  %v993_v31 = vld [vmem:[%s1753_s2] ss:$0 sm:$0xff] }
  0x2a   : > { %1205 = vmatpush3.msra.mxu1 %v292_v32  ;;  %1171 = vmatprep.subr.mxu0 %v961_v33 }
  0x2b   : > { %1206 = vmatprep.subr.mxu1 %v291_v34  ;;  %1172 = vmatpush3.msra.mxu0 %v961_v33 }
  0x2c   : > { %1173 = vmatprep.mubr.f32.mxu0 %v1475_v15  ;;  %1207 = vmatpush3.msra.mxu1 %v291_v34 }
  0x2d   : > { %1208 = vmatprep.mubr.f32.mxu1 %v289_v35  ;;  %1174 = vmatmul.mubr.f32.vlgmr.msra.gmra.mxu0 %v1478_v16  ;;  %v994_v35 = vld [vmem:[%s1754_s3] ss:$0 sm:$0xff] }
  0x2e   : > { %1209 = vmatmul.mubr.f32.vlgmr.msra.gmra.mxu1 %v290_v36  ;;  %1211 = vmatprep.subr.mxu0 %v992_v37 }
  0x2f   : > { %1243 = vmatprep.mubr.f32.mxu0 %v476_v38  ;;  %1212 = vmatpush3.msra.mxu0 %v992_v37 }
  0x30   : > { %1213 = vmatprep.subr.mxu0 %v991_v39  ;;  %1246 = vmatprep.subr.mxu1 %v1010_v55 }
  0x31   : > { %1214 = vmatpush3.msra.mxu0 %v991_v39  ;;  %1247 = vmatpush3.msra.mxu1 %v1010_v55  ;;  %v1017_v55 = vld [vmem:[%s1755_s4 + $0x130] sm:$0xff] }
  0x32   : > { %1215 = vmatprep.subr.mxu0 %v990_v40  ;;  %1248 = vmatprep.subr.mxu1 %v1009_v56 }
  0x33   : > { %1216 = vmatpush3.msra.mxu0 %v990_v40  ;;  %1249 = vmatpush3.msra.mxu1 %v1009_v56  ;;  %v1016_v56 = vld [vmem:[%s1755_s4 + $0x128] sm:$0xff] }
  0x34   : > { %1217 = vmatprep.subr.mxu0 %v989_v41  ;;  %1250 = vmatprep.subr.mxu1 %v1008_v57 }
  0x35   : > { %1218 = vmatpush3.msra.mxu0 %v989_v41  ;;  %1251 = vmatpush3.msra.mxu1 %v1008_v57  ;;  %v1015_v57 = vld [vmem:[%s1755_s4 + $0x120] sm:$0xff] }
  0x36   : > { %1219 = vmatprep.subr.mxu0 %v988_v42  ;;  %1252 = vmatprep.subr.mxu1 %v1007_v58 }
  0x37   : > { %1220 = vmatpush3.msra.mxu0 %v988_v42  ;;  %1253 = vmatpush3.msra.mxu1 %v1007_v58  ;;  %v1014_v58 = vld [vmem:[%s1755_s4 + $0x118] sm:$0xff] }
  0x38   : > { %1221 = vmatprep.subr.mxu0 %v987_v43  ;;  %1254 = vmatprep.subr.mxu1 %v1006_v59 }
  0x39   : > { %1222 = vmatpush3.msra.mxu0 %v987_v43  ;;  %1255 = vmatpush3.msra.mxu1 %v1006_v59  ;;  %v1013_v59 = vld [vmem:[%s1755_s4 + $0x110] sm:$0xff] }
  0x3a   : > { %1223 = vmatprep.subr.mxu0 %v986_v44  ;;  %1256 = vmatprep.subr.mxu1 %v1005_v61 }
  0x3b   : > { %1224 = vmatpush3.msra.mxu0 %v986_v44  ;;  %1257 = vmatpush3.msra.mxu1 %v1005_v61  ;;  %v1025_v44 = vld [vmem:[%s1755_s4 + $0x170] sm:$0xff]  ;;  %v1011_v61 = vld [vmem:[%s1755_s4 + $0x100] sm:$0xff] }
  0x3c   : > { %1225 = vmatprep.subr.mxu0 %v985_v45  ;;  %1258 = vmatprep.subr.mxu1 %v1004_v63 }
  0x3d   : > { %1226 = vmatpush3.msra.mxu0 %v985_v45  ;;  %1259 = vmatpush3.msra.mxu1 %v1004_v63  ;;  %v1024_v45 = vld [vmem:[%s1755_s4 + $0x168] sm:$0xff] }
  0x3e   : > { %1227 = vmatprep.subr.mxu0 %v984_v46  ;;  %1260 = vmatprep.subr.mxu1 %v1003_v1 }
  0x3f   : > { %1228 = vmatpush3.msra.mxu0 %v984_v46  ;;  %1261 = vmatpush3.msra.mxu1 %v1003_v1  ;;  %v1023_v46 = vld [vmem:[%s1755_s4 + $0x160] sm:$0xff] }
  0x40   : > { %1229 = vmatprep.subr.mxu0 %v983_v47  ;;  %1262 = vmatprep.subr.mxu1 %v1002_v3 }
  0x41   : > { %1230 = vmatpush3.msra.mxu0 %v983_v47  ;;  %1263 = vmatpush3.msra.mxu1 %v1002_v3  ;;  %v1022_v47 = vld [vmem:[%s1755_s4 + $0x158] sm:$0xff] }
  0x42   : > { %1231 = vmatprep.subr.mxu0 %v982_v48  ;;  %1264 = vmatprep.subr.mxu1 %v1001_v5 }
  0x43   : > { %1232 = vmatpush3.msra.mxu0 %v982_v48  ;;  %1265 = vmatpush3.msra.mxu1 %v1001_v5 }
  0x44   : > { %1233 = vmatprep.subr.mxu0 %v981_v49  ;;  %1266 = vmatprep.subr.mxu1 %v1000_v7 }
  0x45   : > { %1234 = vmatpush3.msra.mxu0 %v981_v49  ;;  %1267 = vmatpush3.msra.mxu1 %v1000_v7 }
  0x46   : > { %1235 = vmatprep.subr.mxu0 %v980_v50  ;;  %1268 = vmatprep.subr.mxu1 %v999_v9 }
  0x47   : > { %1236 = vmatpush3.msra.mxu0 %v980_v50  ;;  %1269 = vmatpush3.msra.mxu1 %v999_v9 }
  0x48   : > { %1237 = vmatprep.subr.mxu0 %v979_v51  ;;  %1270 = vmatprep.subr.mxu1 %v998_v11 }
  0x49   : > { %1238 = vmatpush3.msra.mxu0 %v979_v51  ;;  %1271 = vmatpush3.msra.mxu1 %v998_v11  ;;  %v1021_v51 = vld [vmem:[%s1755_s4 + $0x150] sm:$0xff] }
  0x4a   : > { %1239 = vmatprep.subr.mxu0 %v978_v52  ;;  %1272 = vmatprep.subr.mxu1 %v997_v13 }
  0x4b   : > { %1240 = vmatpush3.msra.mxu0 %v978_v52  ;;  %1273 = vmatpush3.msra.mxu1 %v997_v13  ;;  %v1020_v52 = vld [vmem:[%s1755_s4 + $0x148] sm:$0xff] }
  0x4c   : > { %1241 = vmatprep.subr.mxu0 %v977_v53  ;;  %1274 = vmatprep.subr.mxu1 %v996_v17 }
  0x4d   : > { %1242 = vmatpush3.msra.mxu0 %v977_v53  ;;  %1275 = vmatpush3.msra.mxu1 %v996_v17  ;;  %v1019_v53 = vld [vmem:[%s1755_s4 + $0x140] sm:$0xff] }
  0x4e   : > { %1244 = vmatmul.mubr.f32.vlgmr.msra.gmra.mxu0 %v477_v54  ;;  %1281 = vmatprep.subr.mxu0 %v609_v60  ;;  %v1018_v54 = vld [vmem:[%s1755_s4 + $0x138] sm:$0xff] }
  0x4f   : > { %1282 = vmatpush3.msra.mxu0 %v609_v60  ;;  %1276 = vmatprep.subr.mxu1 %v995_v19  ;;  %v1012_v60 = vld [vmem:[%s1755_s4 + $0x108] sm:$0xff] }
  0x50   : > { %1283 = vmatprep.subr.mxu0 %v608_v62  ;;  %1277 = vmatpush3.msra.mxu1 %v995_v19 }
  0x51   : > { %1284 = vmatpush3.msra.mxu0 %v608_v62  ;;  %1316 = vmatprep.subr.mxu1 %v1026_v21 }
  0x52   : > { %1285 = vmatprep.subr.mxu0 %v607_v0 }
  0x53   : > { %1286 = vmatpush3.msra.mxu0 %v607_v0 }
  0x54   : > { %1287 = vmatprep.subr.mxu0 %v606_v2 }
  0x55   : > { %1288 = vmatpush3.msra.mxu0 %v606_v2 }
  0x56   : > { %1289 = vmatprep.subr.mxu0 %v605_v4 }
  0x57   : > { %1290 = vmatpush3.msra.mxu0 %v605_v4  ;;  %v1027_v4 = vld [vmem:[%s1756_s5] ss:$0 sm:$0xff] }
  0x58   : > { %1291 = vmatprep.subr.mxu0 %v604_v6 }
  0x59   : > { %1292 = vmatpush3.msra.mxu0 %v604_v6 }
  0x5a   : > { %1293 = vmatprep.subr.mxu0 %v603_v8 }
  0x5b   : > { %1294 = vmatpush3.msra.mxu0 %v603_v8  ;;  %v1028_v8 = vld [vmem:[%s1757_s6] ss:$0 sm:$0xff] }
  0x5c   : > { %1295 = vmatprep.subr.mxu0 %v602_v10 }
  0x5d   : > { %1296 = vmatpush3.msra.mxu0 %v602_v10 }
  0x5e   : > { %1297 = vmatprep.subr.mxu0 %v601_v12 }
  0x5f   : > { %1298 = vmatpush3.msra.mxu0 %v601_v12 }
  0x60   : > { %1299 = vmatprep.subr.mxu0 %v600_v14 }
  0x61   : > { %1300 = vmatpush3.msra.mxu0 %v600_v14 }
  0x62   : > { %1301 = vmatprep.subr.mxu0 %v599_v18 }
  0x63   : > { %1302 = vmatpush3.msra.mxu0 %v599_v18 }
  0x64   : > { %1303 = vmatprep.subr.mxu0 %v598_v20 }
  0x65   : > { %1304 = vmatpush3.msra.mxu0 %v598_v20 }
  0x66   : > { %1305 = vmatprep.subr.mxu0 %v597_v22 }
  0x67   : > { %1306 = vmatpush3.msra.mxu0 %v597_v22 }
  0x68   : > { %1307 = vmatprep.subr.mxu0 %v596_v23 }
  0x69   : > { %1308 = vmatpush3.msra.mxu0 %v596_v23 }
  0x6a   : > { %1309 = vmatprep.subr.mxu0 %v595_v24 }
  0x6b   : > { %1310 = vmatpush3.msra.mxu0 %v595_v24 }
  0x6c   : > { %1311 = vmatprep.subr.mxu0 %v594_v25 }
  0x6d   : > { %1312 = vmatpush3.msra.mxu0 %v594_v25 }
  0xed   : > { %v1175_v26 = vpop.f32.mrf.mxu0 }
  0xee   : > { %v1210_v27 = vpop.f32.mrf.mxu1 }
  0xef   : > { %v392_v28 = vpop.f32.mrf.mxu0  ;;  %v473_v30 = vadd.f32 %v1210_v27, %v1175_v26 }
  0xf0   : > { %v467_v29 = vpop.f32.mrf.mxu1 }
  0xf1   : > { %v468_v33 = vadd.f32 %v467_v29, %v392_v28 }
 0x10e   : > { %v1245_v32 = vpop.f32.mrf.mxu0 }
 0x10f   : > { %v571_v34 = vadd.f32 %v1245_v32, %v473_v30 }
 0x110   : > { %v561_v36 = vpop.f32.mrf.mxu0 }
 0x111   : > { %v579_v37 = vmul.f32 %v993_v31, %v571_v34  ;;  %v570_v38 = vadd.f32 %v561_v36, %v468_v33 }
 0x113   : > { %v587_v39 = vadd.f32 %v994_v35, %v579_v37  ;;  %v578_v40 = vmul.f32 %v993_v31, %v570_v38 }
 0x115   : > { %1360 = vtanh.f32 %v587_v39  ;;  %v586_v41 = vadd.f32 %v994_v35, %v578_v40 }
 0x117   : > { %1362 = vtanh.f32 %v586_v41 }
 0x122   : > { %v1361_v42 = vpop.eup %1360 }
 0x123   : > { %591 = vst [vmem:[#allocation2 + $0x9] sm:$0xff] %v1361_v42 }
 0x124   : > { %v1363_v43 = vpop.eup %1362 }
 0x125   : > { %590 = vst [vmem:[#allocation2 + $0x1] sm:$0xff] %v1363_v43  ;;  %1278 = vmatprep.mubr.f32.mxu1 %v1363_v43 }
 0x126   : > { %1279 = vmatmul.mubr.f32.vlgmr.msra.gmra.mxu1 %v1361_v42 }
 0x127   : > { %1317 = vmatpush3.msra.mxu1 %v1026_v21 }
 0x128   : > { %1318 = vmatprep.subr.mxu1 %v1025_v44 }
 0x129   : > { %1319 = vmatpush3.msra.mxu1 %v1025_v44 }
 0x12a   : > { %1320 = vmatprep.subr.mxu1 %v1024_v45  ;;  %v780_v62 = vld [vmem:[#allocation2 + $0xa] sm:$0xff] }
 0x12b   : > { %1321 = vmatpush3.msra.mxu1 %v1024_v45 }
 0x12c   : > { %v592_v48 = vld [vmem:[#allocation2] sm:$0xff]  ;;  %v593_v49 = vld [vmem:[#allocation2 + $0x8] sm:$0xff]  ;;  %1322 = vmatprep.subr.mxu1 %v1023_v46 }
 0x12d   : > { %v779_v50 = vld [vmem:[#allocation2 + $0x2] sm:$0xff]  ;;  %1313 = vmatprep.mubr.f32.mxu0 %v592_v48  ;;  %1323 = vmatpush3.msra.mxu1 %v1023_v46 }
 0x12e   : > { %1348 = vmatprep.mubr.f32.mxu1 %v779_v50  ;;  %1314 = vmatmul.mubr.f32.vlgmr.msra.gmra.mxu0 %v593_v49 }
 0x12f   : > { %1324 = vmatprep.subr.mxu1 %v1022_v47 }
 0x130   : > { %1325 = vmatpush3.msra.mxu1 %v1022_v47 }
 0x131   : > { %1326 = vmatprep.subr.mxu1 %v1021_v51 }
 0x132   : > { %1327 = vmatpush3.msra.mxu1 %v1021_v51 }
 0x133   : > { %1328 = vmatprep.subr.mxu1 %v1020_v52 }
 0x134   : > { %1329 = vmatpush3.msra.mxu1 %v1020_v52 }
 0x135   : > { %1330 = vmatprep.subr.mxu1 %v1019_v53 }
 0x136   : > { %1331 = vmatpush3.msra.mxu1 %v1019_v53 }
 0x137   : > { %1332 = vmatprep.subr.mxu1 %v1018_v54 }
 0x138   : > { %1333 = vmatpush3.msra.mxu1 %v1018_v54 }
 0x139   : > { %1334 = vmatprep.subr.mxu1 %v1017_v55 }
 0x13a   : > { %1335 = vmatpush3.msra.mxu1 %v1017_v55 }
 0x13b   : > { %1336 = vmatprep.subr.mxu1 %v1016_v56 }
 0x13c   : > { %1337 = vmatpush3.msra.mxu1 %v1016_v56 }
 0x13d   : > { %1338 = vmatprep.subr.mxu1 %v1015_v57 }
 0x13e   : > { %1339 = vmatpush3.msra.mxu1 %v1015_v57 }
 0x13f   : > { %1340 = vmatprep.subr.mxu1 %v1014_v58 }
 0x140   : > { %1341 = vmatpush3.msra.mxu1 %v1014_v58 }
 0x141   : > { %1342 = vmatprep.subr.mxu1 %v1013_v59 }
 0x142   : > { %1343 = vmatpush3.msra.mxu1 %v1013_v59 }
 0x143   : > { %1344 = vmatprep.subr.mxu1 %v1012_v60 }
 0x144   : > { %1345 = vmatpush3.msra.mxu1 %v1012_v60 }
 0x145   : > { %1346 = vmatprep.subr.mxu1 %v1011_v61 }
 0x146   : > { %1347 = vmatpush3.msra.mxu1 %v1011_v61 }
 0x147   : > { %1349 = vmatmul.mubr.f32.vlgmr.msra.gmra.mxu1 %v780_v62 }
 0x1e6   : > { %v1280_v63 = vpop.f32.mrf.mxu1 }
 0x1e8   : > { %v695_v1 = vpop.f32.mrf.mxu1 }
 0x1ee   : > { %v1315_v0 = vpop.f32.mrf.mxu0 }
 0x1ef   : > { %v776_v3 = vadd.f32 %v1315_v0, %v1280_v63 }
 0x1f0   : > { %v770_v2 = vpop.f32.mrf.mxu0 }
 0x1f1   : > { %v771_v6 = vadd.f32 %v770_v2, %v695_v1 }
 0x207   : > { %v1350_v5 = vpop.f32.mrf.mxu1 }
 0x208   : > { %v874_v7 = vadd.f32 %v1350_v5, %v776_v3 }
 0x209   : > { %v864_v9 = vpop.f32.mrf.mxu1 }
 0x20a   : > { %v882_v10 = vmul.f32 %v1027_v4, %v874_v7  ;;  %v873_v11 = vadd.f32 %v864_v9, %v771_v6 }
 0x20c   : > { %v890_v12 = vadd.f32 %v1028_v8, %v882_v10  ;;  %v881_v13 = vmul.f32 %v1027_v4, %v873_v11 }
 0x20e   : > { %v892_v14 = vadd.f32 %v890_v12, %v1478_v16  ;;  %v889_v17 = vadd.f32 %v1028_v8, %v881_v13 }
 0x210   : > { %1364 = vtanh.f32 %v892_v14  ;;  %v891_v18 = vadd.f32 %v889_v17, %v1475_v15 }
 0x212   : > { %1366 = vtanh.f32 %v891_v18 }
 0x21d   : > { %v1365_v19 = vpop.eup %1364 }
 0x21e   : > { %896 = vst [vmem:[%s278_s8 + $0x8] sm:$0xff] %v1365_v19 }
 0x21f   : > { %v1367_v20 = vpop.eup %1366 }
 0x220   : > { %895 = vst [vmem:[%s278_s8] sm:$0xff] %v1367_v20 }
 0x221 PF: > { %s17_s24 = sadd.s32 1, %s1374_s24  }
 0x222   : > { %p14_p4 = scmp.ge.s32.totalorder %s17_s24, 4  }
 0x224   :  { %16 = sbr.rel (!%p14_p4) target bundleno = 1 (0x1), region = 82 }

</bundles_post_ra>
